<compile_context>
chip_gen: v6e
topology: v6e:2x2x1
jax: 0.10.0
libtpu: 0.0.40
codegen_flags: <defaults>
</compile_context>

<pallas_src>
import jax
import jax.numpy as jnp
from jax.experimental import pallas as pl
from jax.experimental.pallas import tpu as pltpu


# --------------------------------------------------------------------------- #
# Kernel
# --------------------------------------------------------------------------- #
def _student_fused_kernel(x_ref, w_ref, b_ref, o_ref):
    """y = x @ W_blk + b_blk  (one MXU matmul, f32 accumulation).

    x_ref: (tb, Kp)  f32 activation tile (cast to weight dtype here)
    w_ref: (Kp, Np)  fused block-diagonal weight, resident across the grid
    b_ref: (1,  Np)  fused bias (f32)
    o_ref: (tb, Np)  output tile (bf16 or f32), lane-dense when packed
    """
    x = x_ref[...]
    if x.dtype != w_ref.dtype:
        # In-kernel cast (VPU slack); avoids a wrapper-side XLA cast that would
        # round-trip a bf16 copy of x through HBM before the kernel reads it.
        x = x.astype(w_ref.dtype)
    acc = jnp.dot(x, w_ref[...], preferred_element_type=jnp.float32)
    o_ref[...] = (acc + b_ref[...]).astype(o_ref.dtype)


# --------------------------------------------------------------------------- #
# Hardware helpers
# --------------------------------------------------------------------------- #
def _device_kind():
    try:
        return jax.devices()[0].device_kind.lower()
    except Exception:
        return ""


def _is_two_tensorcore_chip(kind):
    # v7x has 2 TensorCores per chip; v4 megacore likewise.  v5e/v6e: 1 TC.
    return ("v7" in kind) or ("v4" in kind)


def _vmem_limit_bytes(kind):
    if "v7" in kind:
        return 40 * 1024 * 1024   # 64 MiB physical -> leave double-buffer headroom
    if ("v5" in kind) or ("v6" in kind):
        return 64 * 1024 * 1024   # 128 MiB physical
    return 32 * 1024 * 1024       # unknown: conservative


def _pick_batch_tile(rows, *, max_tile=1024, sublane_mult=8, want_two_steps=False):
    """Largest divisor of `rows` <= max_tile that is a multiple of sublane_mult
    (or == rows).  Only halves the target (>=2 grid steps) on 2-TC chips."""
    target = min(max_tile, rows)
    if want_two_steps and rows >= 2 * sublane_mult:
        target = min(target, rows // 2)
    for t in range(target, 0, -1):
        if rows % t == 0 and (t % sublane_mult == 0 or t == rows):
            return t
    return rows


# --------------------------------------------------------------------------- #
# One-time parameter preparation (hoisted out of the per-call path)
# --------------------------------------------------------------------------- #
def prepare_student(w1, b1, w2, b2, *, use_bf16=True, out_dtype=jnp.bfloat16):
    """Fuse the two Linear layers and pre-pack/cast the weights ONCE.

    w1: (input_dim, emb_dim)  (transposed PyTorch weight)
    b1: (emb_dim,)
    w2: (emb_dim, emb_dim)    (transposed PyTorch weight)
    b2: (emb_dim,)
    """
    input_dim, emb_dim = w1.shape

    # 1. Exact algebraic fusion (f32).
    wf = w1 @ w2                 # (input_dim, emb_dim)
    bf = b1 @ w2 + b2            # (emb_dim,)

    # 2. Lane-dense packing factor (chosen from dims only, so it can be baked
    #    into the prepacked weight; B is padded at call time if needed).
    wbytes = 2 if use_bf16 else 4
    pack = 1
    if emb_dim < 128:
        for p in (8, 4, 2):
            if (p * input_dim) * (p * emb_dim) * wbytes <= (2 << 20):
                pack = p
                break
    Kp, Np = pack * input_dim, pack * emb_dim

    if pack > 1:
        w_blk = jnp.kron(jnp.eye(pack, dtype=wf.dtype), wf)   # (Kp, Np)
        b_blk = jnp.tile(bf, pack)                             # (Np,)
    else:
        w_blk, b_blk = wf, bf

    w_blk = w_blk.astype(jnp.bfloat16 if use_bf16 else jnp.float32)
    b_2d = b_blk.reshape(1, Np).astype(jnp.float32)

    return {
        "w_blk": w_blk, "b_2d": b_2d, "wf": wf, "bf": bf,
        "pack": pack, "Kp": Kp, "Np": Np,
        "input_dim": input_dim, "emb_dim": emb_dim,
        "out_dtype": jnp.dtype(out_dtype),
    }


# --------------------------------------------------------------------------- #
# pallas_call wrapper
# --------------------------------------------------------------------------- #
def _run_pallas(x_in, w_blk, b_2d, *, tb, Kp, Np, out_dtype, vmem_limit, cost,
                single_buffer_resident):
    Bp = x_in.shape[0]

    def resident_spec(shape):
        if single_buffer_resident:
            # Constant index_map -> no point double-buffering the weight/bias.
            return pl.BlockSpec(shape, lambda i: (0, 0), pipeline_mode=pl.Buffered(1))
        return pl.BlockSpec(shape, lambda i: (0, 0))

    return pl.pallas_call(
        _student_fused_kernel,
        out_shape=jax.ShapeDtypeStruct((Bp, Np), out_dtype),
        grid_spec=pltpu.PrefetchScalarGridSpec(
            num_scalar_prefetch=0,
            grid=(Bp // tb,),
            in_specs=[
                pl.BlockSpec((tb, Kp), lambda i: (i, 0)),   # activations tile
                resident_spec((Kp, Np)),                    # fused weight (resident)
                resident_spec((1, Np)),                     # fused bias   (resident)
            ],
            out_specs=pl.BlockSpec((tb, Np), lambda i: (i, 0)),
        ),
        compiler_params=pltpu.CompilerParams(
            dimension_semantics=("parallel",),
            vmem_limit_bytes=vmem_limit,
        ),
        cost_estimate=cost,
    )(x_in, w_blk, b_2d)


def student_forward(x, params, *, tb=None, xla_fallback_below=None):
    """Fused forward of Student.mlp using prepacked params from prepare_student.

    x: (B, input_dim) float32.  Returns (B, emb_dim) in params['out_dtype'].
    """
    B, input_dim = x.shape
    assert input_dim == params["input_dim"]
    emb_dim = params["emb_dim"]
    out_dtype = params["out_dtype"]

    # Tiny-batch fallback: a single XLA fusion beats any kernel launch.
    if xla_fallback_below is not None and B < xla_fallback_below:
        return (x @ params["wf"] + params["bf"]).astype(out_dtype)

    pack, Kp, Np = params["pack"], params["Kp"], params["Np"]

    # Pad the batch to a multiple of the pack factor if necessary (rare path).
    Bpad = ((B + pack - 1) // pack) * pack
    if Bpad != B:
        x = jnp.pad(x, ((0, Bpad - B), (0, 0)))
    Bp = Bpad // pack

    # Row-major contiguous reshape: free (no data movement).  x stays f32; the
    # bf16 cast happens inside the kernel.
    x_in = x.reshape(Bp, Kp)

    kind = _device_kind()
    sublane_mult = 16 if out_dtype == jnp.bfloat16 else 8
    if tb is None:
        tb = _pick_batch_tile(
            Bp, max_tile=1024, sublane_mult=sublane_mult,
            want_two_steps=_is_two_tensorcore_chip(kind))
    assert Bp % tb == 0, "packed batch must be divisible by the batch tile"

    wbytes = params["w_blk"].dtype.itemsize
    obytes = jnp.dtype(out_dtype).itemsize
    cost = pl.CostEstimate(
        flops=2 * B * input_dim * emb_dim,      # useful FLOPs (no block-diag redundancy)
        transcendentals=0,
        bytes_accessed=Bp * Kp * 4 + Kp * Np * wbytes + Np * 4 + Bp * Np * obytes,
    )

    kwargs = dict(tb=tb, Kp=Kp, Np=Np, out_dtype=out_dtype,
                  vmem_limit=_vmem_limit_bytes(kind), cost=cost)
    try:
        out = _run_pallas(x_in, params["w_blk"], params["b_2d"],
                          single_buffer_resident=True, **kwargs)
    except Exception:
        # Fallback if single-buffered (pl.Buffered(1)) resident specs are not
        # supported by this jax/Mosaic version.
        out = _run_pallas(x_in, params["w_blk"], params["b_2d"],
                          single_buffer_resident=False, **kwargs)

    # Undo the packing: (Bp, pack*emb) is row-major identical to (Bpad, emb).
    out = out.reshape(Bpad, emb_dim)
    if Bpad != B:
        out = out[:B]
    return out


# --------------------------------------------------------------------------- #
# Init (mimics PyTorch nn.Linear defaults: U(-1/sqrt(fan_in), +1/sqrt(fan_in)))
# --------------------------------------------------------------------------- #
def init_student_params(key, input_dim, emb_dim):
    k1, k2, k3, k4 = jax.random.split(key, 4)
    bound1 = 1.0 / jnp.sqrt(jnp.float32(input_dim))
    bound2 = 1.0 / jnp.sqrt(jnp.float32(emb_dim))
    # Stored already transposed: (in_features, out_features)
    w1 = jax.random.uniform(k1, (input_dim, emb_dim), jnp.float32, -bound1, bound1)
    b1 = jax.random.uniform(k2, (emb_dim,), jnp.float32, -bound1, bound1)
    w2 = jax.random.uniform(k3, (emb_dim, emb_dim), jnp.float32, -bound2, bound2)
    b2 = jax.random.uniform(k4, (emb_dim,), jnp.float32, -bound2, bound2)
    return w1, b1, w2, b2


if __name__ == "__main__":
    key = jax.random.PRNGKey(0)
    kx, kp = jax.random.split(key)

    B, input_dim, emb_dim = 128, 16, 32
    x = jax.random.normal(kx, (B, input_dim), dtype=jnp.float32)
    w1, b1, w2, b2 = init_student_params(kp, input_dim, emb_dim)

    # Reference in plain JAX (same math as the torch nn.Linear chain).
    ref = (x @ w1 + b1) @ w2 + b2

    # Exact fp32 path (validates the fusion + lane-dense packing structure).
    params_f32 = prepare_student(w1, b1, w2, b2, use_bf16=False, out_dtype=jnp.float32)
    out_f32 = jax.block_until_ready(student_forward(x, params_f32))
    assert out_f32.shape == (B, emb_dim)
    assert jnp.allclose(out_f32, ref, atol=1e-4, rtol=1e-4)

    # Default fast path: bf16 weight + bf16 output, f32 accumulation,
    # in-kernel activation cast.
    params_bf16 = prepare_student(w1, b1, w2, b2, use_bf16=True, out_dtype=jnp.bfloat16)
    out_bf16 = jax.block_until_ready(student_forward(x, params_bf16))
    assert out_bf16.shape == (B, emb_dim)
    assert jnp.allclose(out_bf16.astype(jnp.float32), ref, atol=7e-2, rtol=7e-2)

    print("KERNEL_OK")
</pallas_src>

<mosaic_0001>
module attributes {stable_mosaic.version = 11 : i64} {
  func.func @_student_fused_kernel(%arg0: i32, %arg1: memref<16x128xf32, #tpu.memory_space<vmem>>, %arg2: memref<128x256xf32, #tpu.memory_space<vmem>>, %arg3: memref<1x256xf32, #tpu.memory_space<vmem>>, %arg4: memref<16x256xf32, #tpu.memory_space<vmem>>) attributes {dimension_semantics = [#tpu.dimension_semantics<parallel>], iteration_bounds = array<i64: 1>, scalar_prefetch = 0 : i64, scratch_operands = 0 : i64, tpu.core_type = #tpu.core_type<tc>, window_params = [{transform_indices = @transform_0, window_bounds = array<i64: 16, 128>}, {pipeline_mode = #tpu.pipeline_mode<synchronous>, transform_indices = @transform_1, window_bounds = array<i64: 128, 256>}, {pipeline_mode = #tpu.pipeline_mode<synchronous>, transform_indices = @transform_2, window_bounds = array<i64: 1, 256>}, {transform_indices = @transform_3, window_bounds = array<i64: 16, 256>}]} {
    %c0 = arith.constant 0 : index
    %c0_0 = arith.constant 0 : index
    %0 = vector.load %arg1[%c0, %c0_0] : memref<16x128xf32, #tpu.memory_space<vmem>>, vector<16x128xf32>
    %c0_1 = arith.constant 0 : index
    %c0_2 = arith.constant 0 : index
    %1 = vector.load %arg2[%c0_1, %c0_2] : memref<128x256xf32, #tpu.memory_space<vmem>>, vector<128x256xf32>
    %cst = arith.constant dense<0.000000e+00> : vector<16x256xf32>
    %2 = tpu.matmul %0, %1, %cst {dimension_numbers = #tpu.dot_dimension_numbers<[1], [0], [0], [1], [0, 0, 1, 1], [], []>} : vector<16x128xf32>, vector<128x256xf32>, vector<16x256xf32> -> vector<16x256xf32>
    %c0_3 = arith.constant 0 : index
    %c0_4 = arith.constant 0 : index
    %3 = vector.load %arg3[%c0_3, %c0_4] : memref<1x256xf32, #tpu.memory_space<vmem>>, vector<1x256xf32>
    %4 = vector.broadcast %3 : vector<1x256xf32> to vector<16x256xf32>
    %5 = arith.addf %2, %4 : vector<16x256xf32>
    %c0_5 = arith.constant 0 : index
    %c0_6 = arith.constant 0 : index
    %6 = vector.load %arg4[%c0_5, %c0_6] : memref<16x256xf32, #tpu.memory_space<vmem>>, vector<16x256xf32>
    tpu.vector_store %arg4[%c0_5, %c0_6], %5 {strides = array<i32>} : memref<16x256xf32, #tpu.memory_space<vmem>>, vector<16x256xf32>,
    return
  }
  func.func @transform_0(%arg0: i32) -> (i32, i32) {
    %c0_i32 = arith.constant 0 : i32
    %c0_i32_0 = arith.constant 0 : i32
    return %arg0, %c0_i32 : i32, i32
  }
  func.func @transform_1(%arg0: i32) -> (i32, i32) {
    %c0_i32 = arith.constant 0 : i32
    %c0_i32_0 = arith.constant 0 : i32
    %c0_i32_1 = arith.constant 0 : i32
    return %c0_i32, %c0_i32_0 : i32, i32
  }
  func.func @transform_2(%arg0: i32) -> (i32, i32) {
    %c0_i32 = arith.constant 0 : i32
    %c0_i32_0 = arith.constant 0 : i32
    %c0_i32_1 = arith.constant 0 : i32
    return %c0_i32, %c0_i32_0 : i32, i32
  }
  func.func @transform_3(%arg0: i32) -> (i32, i32) {
    %c0_i32 = arith.constant 0 : i32
    %c0_i32_0 = arith.constant 0 : i32
    return %arg0, %c0_i32 : i32, i32
  }
}

module attributes {stable_mosaic.version = 11 : i64} {
  func.func @_student_fused_kernel(%arg0: i32, %arg1: memref<16x128xf32, #tpu.memory_space<vmem>>, %arg2: memref<128x256xf32, #tpu.memory_space<vmem>>, %arg3: memref<1x256xf32, #tpu.memory_space<vmem>>, %arg4: memref<16x256xf32, #tpu.memory_space<vmem>>) attributes {dimension_semantics = [#tpu.dimension_semantics<parallel>], iteration_bounds = array<i64: 1>, scalar_prefetch = 0 : i64, scratch_operands = 0 : i64, tpu.core_type = #tpu.core_type<tc>, window_params = [{transform_indices = @transform_0, window_bounds = array<i64: 16, 128>}, {pipeline_mode = #tpu.pipeline_mode<synchronous>, transform_indices = @transform_1, window_bounds = array<i64: 128, 256>}, {pipeline_mode = #tpu.pipeline_mode<synchronous>, transform_indices = @transform_2, window_bounds = array<i64: 1, 256>}, {transform_indices = @transform_3, window_bounds = array<i64: 16, 256>}]} {
    %c0 = arith.constant 0 : index
    %c0_0 = arith.constant 0 : index
    %0 = vector.load %arg1[%c0, %c0_0] : memref<16x128xf32, #tpu.memory_space<vmem>>, vector<16x128xf32>
    %c0_1 = arith.constant 0 : index
    %c0_2 = arith.constant 0 : index
    %1 = vector.load %arg2[%c0_1, %c0_2] : memref<128x256xf32, #tpu.memory_space<vmem>>, vector<128x256xf32>
    %cst = arith.constant dense<0.000000e+00> : vector<16x256xf32>
    %2 = tpu.matmul %0, %1, %cst {dimension_numbers = #tpu.dot_dimension_numbers<[1], [0], [0], [1], [0, 0, 1, 1], [], []>} : vector<16x128xf32>, vector<128x256xf32>, vector<16x256xf32> -> vector<16x256xf32>
    %c0_3 = arith.constant 0 : index
    %c0_4 = arith.constant 0 : index
    %3 = vector.load %arg3[%c0_3, %c0_4] : memref<1x256xf32, #tpu.memory_space<vmem>>, vector<1x256xf32>
    %4 = vector.broadcast %3 : vector<1x256xf32> to vector<16x256xf32>
    %5 = arith.addf %2, %4 : vector<16x256xf32>
    %c0_5 = arith.constant 0 : index
    %c0_6 = arith.constant 0 : index
    %6 = vector.load %arg4[%c0_5, %c0_6] : memref<16x256xf32, #tpu.memory_space<vmem>>, vector<16x256xf32>
    tpu.vector_store %arg4[%c0_5, %c0_6], %5 {strides = array<i32>} : memref<16x256xf32, #tpu.memory_space<vmem>>, vector<16x256xf32>,
    return
  }
  func.func @transform_0(%arg0: i32) -> (i32, i32) {
    %c0_i32 = arith.constant 0 : i32
    %c0_i32_0 = arith.constant 0 : i32
    return %arg0, %c0_i32 : i32, i32
  }
  func.func @transform_1(%arg0: i32) -> (i32, i32) {
    %c0_i32 = arith.constant 0 : i32
    %c0_i32_0 = arith.constant 0 : i32
    %c0_i32_1 = arith.constant 0 : i32
    return %c0_i32, %c0_i32_0 : i32, i32
  }
  func.func @transform_2(%arg0: i32) -> (i32, i32) {
    %c0_i32 = arith.constant 0 : i32
    %c0_i32_0 = arith.constant 0 : i32
    %c0_i32_1 = arith.constant 0 : i32
    return %c0_i32, %c0_i32_0 : i32, i32
  }
  func.func @transform_3(%arg0: i32) -> (i32, i32) {
    %c0_i32 = arith.constant 0 : i32
    %c0_i32_0 = arith.constant 0 : i32
    return %arg0, %c0_i32 : i32, i32
  }
}

</mosaic_0001>

<bundles_post_ra>
// kernel: tpu_custom_call.1
= control target key start
LH: loop header
LB: loop body
LE: loop exit
PB: predicated region body
PF: predicated region fallthrough
CT: control target
= control target key end

     0   :  { %8 = vsyncpa [#allocation3], 0  ;;  %s340_s0 = inlined_call_operand.hbm [shape: f32[16,128], index: 0, kind: input, shape index: {}]   ;;  %s341_s1 = inlined_call_operand.hbm [shape: f32[128,256], index: 1, kind: input, shape index: {}]   ;;  %s342_s2 = inlined_call_operand.vmem [shape: f32[1,256], index: 2, kind: input, shape index: {}]   ;;  %s343_s3 = inlined_call_operand.hbm [shape: f32[16,256], index: 3, kind: output, shape index: {}]  }
   0x1   :  { %9 = vsyncpa [#allocation6], 0 }
   0x2   :  { %10 = vsyncpa [#allocation4], 0  ;;  %s294_s12 = smov [#allocation2]  }
   0x3   :  { %s16_s13 = sshll.u32 %s294_s12, 4  ;;  %s17_s13 = int_to_ptr.vmem [resolvable:$true] %s16_s13 }
   0x4   :  { %s236_s14 = scalar_lea.vmem %s17_s13, 256  ;;  %p241_p1 = scmp.lt.s32.totalorder %s17_s13, %s17_s13 }
   0x5   :  { %p237_p0 = scmp.ne.s32.totalorder %s17_s13, %s236_s14  ;;  %p242_p2 = scmp.lt.s32.totalorder %s236_s14, %s236_s14 }
   0x7   :  { %p243_p3 = por %p242_p2, %p241_p1 }
   0x9   :  { %p244_p4 = pnand %p243_p3, %p237_p0 }
   0xb   :  { %247 = shalt.err (!%p244_p4)
}
   0xc   :  { %s295_s15 = smov 128   ;;  %s296_s16 = smov 8  }
   0xd   :  { %22 = dma.hbm_to_vmem [thread:$0]  %s340_s0, 256, %s17_s13, [#allocation3], %s295_s15, %s295_s15, %s296_s16  }
   0xe   :  { %s297_s19 = smov [#allocation5]  }
   0xf   :  { %s28_s20 = sshll.u32 %s297_s19, 4  ;;  %s29_s20 = int_to_ptr.vmem [resolvable:$true] %s28_s20 }
  0x10   :  { %s256_s21 = scalar_lea.vmem %s29_s20, 4096  ;;  %p261_p6 = scmp.lt.s32.totalorder %s29_s20, %s29_s20 }
  0x11   :  { %p257_p5 = scmp.ne.s32.totalorder %s29_s20, %s256_s21  ;;  %p262_p7 = scmp.lt.s32.totalorder %s256_s21, %s256_s21 }
  0x13   :  { %p263_p8 = por %p262_p7, %p261_p6 }
  0x15   :  { %p264_p9 = pnand %p263_p8, %p257_p5 }
  0x17   :  { %267 = shalt.err (!%p264_p9)
}
  0x18   :  { %s298_s22 = smov 256   ;;  %s299_s23 = smov 16  }
  0x19   :  { %34 = dma.hbm_to_vmem [thread:$0]  %s341_s1, 4096, %s29_s20, [#allocation6], %s298_s22, %s298_s22, %s299_s23  }
  0x1a   :  { %288 = dma.done.wait [#allocation3], 256  }
  0x1b   :  { %289 = vsyncadd [#allocation3], 4294967040 }
  0x1c   :  { %290 = dma.done.wait [#allocation6], 4096  }
  0x1d   :  { %291 = vsyncadd [#allocation6], 4294963200  ;;  %v300_v0 = vmov 0.0   ;;  %v76_v1 = vld [vmem:[#allocation5 + $0xf8] sm:$0xff]  ;;  %v75_v2 = vld [vmem:[#allocation5 + $0xf0] sm:$0xff]  ;;  %v79_v35 = vlaneseq  ;;  %s301_s26 = smov [#allocation7]  }
  0x1e   :  { %153 = vmatprep.mubr.f32.mxu0 %v300_v0  ;;  %159 = vmatprep.mubr.f32.mxu1 %v300_v0  ;;  %v74_v3 = vld [vmem:[#allocation5 + $0xe8] sm:$0xff]  ;;  %v73_v4 = vld [vmem:[#allocation5 + $0xe0] sm:$0xff]  ;;  %v72_v5 = vld [vmem:[#allocation5 + $0xd8] sm:$0xff]  ;;  %s175_s27 = sshll.u32 %s301_s26, 4  ;;  %s176_s27 = int_to_ptr.vmem [resolvable:$true] %s175_s27 }
  0x1f   :  { %89 = vmatprep.subr.mxu0 %v76_v1  ;;  %188 = vmatprep.subr.mxu1 %v76_v1  ;;  %v71_v6 = vld [vmem:[#allocation5 + $0xd0] sm:$0xff]  ;;  %v70_v7 = vld [vmem:[#allocation5 + $0xc8] sm:$0xff]  ;;  %v69_v8 = vld [vmem:[#allocation5 + $0xc0] sm:$0xff]  ;;  %v80_v36 = vshrl.u32 %v79_v35, 7  ;;  %s268_s28 = scalar_lea.vmem %s176_s27, 512  ;;  %p273_p11 = scmp.lt.s32.totalorder %s176_s27, %s176_s27 }
  0x20   :  { %90 = vmatpush1.msra.mxu0 %v75_v2  ;;  %204 = vmatpush1.msra.mxu1 %v75_v2  ;;  %v68_v9 = vld [vmem:[#allocation5 + $0xb8] sm:$0xff]  ;;  %v67_v10 = vld [vmem:[#allocation5 + $0xb0] sm:$0xff]  ;;  %v66_v11 = vld [vmem:[#allocation5 + $0xa8] sm:$0xff]  ;;  %p269_p10 = scmp.ne.s32.totalorder %s176_s27, %s268_s28  ;;  %p274_p12 = scmp.lt.s32.totalorder %s268_s28, %s268_s28 }
  0x21   :  { %91 = vmatprep.subr.mxu0 %v74_v3  ;;  %189 = vmatprep.subr.mxu1 %v74_v3  ;;  %v65_v12 = vld [vmem:[#allocation5 + $0xa0] sm:$0xff]  ;;  %v64_v13 = vld [vmem:[#allocation5 + $0x98] sm:$0xff]  ;;  %v63_v14 = vld [vmem:[#allocation5 + $0x90] sm:$0xff]  ;;  %v81_v37 = vsub.s32 0, %v80_v36  ;;  %v85_v39 = vsub.s32 1, %v80_v36 }
  0x22   :  { %92 = vmatpush1.msra.mxu0 %v73_v4  ;;  %205 = vmatpush1.msra.mxu1 %v73_v4  ;;  %v62_v15 = vld [vmem:[#allocation5 + $0x88] sm:$0xff]  ;;  %v61_v16 = vld [vmem:[#allocation5 + $0x80] sm:$0xff]  ;;  %v60_v17 = vld [vmem:[#allocation5 + $0x78] sm:$0xff]  ;;  %p275_p13 = por %p274_p12, %p273_p11 }
  0x23   :  { %93 = vmatprep.subr.mxu0 %v72_v5  ;;  %190 = vmatprep.subr.mxu1 %v72_v5  ;;  %v59_v18 = vld [vmem:[#allocation5 + $0x70] sm:$0xff]  ;;  %v58_v19 = vld [vmem:[#allocation5 + $0x68] sm:$0xff]  ;;  %v57_v20 = vld [vmem:[#allocation5 + $0x60] sm:$0xff] }
  0x24   :  { %94 = vmatpush1.msra.mxu0 %v71_v6  ;;  %206 = vmatpush1.msra.mxu1 %v71_v6  ;;  %v56_v21 = vld [vmem:[#allocation5 + $0x58] sm:$0xff]  ;;  %v55_v22 = vld [vmem:[#allocation5 + $0x50] sm:$0xff]  ;;  %v54_v23 = vld [vmem:[#allocation5 + $0x48] sm:$0xff]  ;;  %p276_p0 = pnand %p275_p13, %p269_p10 }
  0x25   :  { %95 = vmatprep.subr.mxu0 %v70_v7  ;;  %191 = vmatprep.subr.mxu1 %v70_v7  ;;  %v53_v24 = vld [vmem:[#allocation5 + $0x40] sm:$0xff]  ;;  %v52_v25 = vld [vmem:[#allocation5 + $0x38] sm:$0xff]  ;;  %v51_v26 = vld [vmem:[#allocation5 + $0x30] sm:$0xff] }
  0x26   :  { %96 = vmatpush1.msra.mxu0 %v69_v8  ;;  %207 = vmatpush1.msra.mxu1 %v69_v8  ;;  %v50_v27 = vld [vmem:[#allocation5 + $0x28] sm:$0xff]  ;;  %v49_v28 = vld [vmem:[#allocation5 + $0x20] sm:$0xff]  ;;  %v48_v29 = vld [vmem:[#allocation5 + $0x18] sm:$0xff] }
  0x27   :  { %97 = vmatprep.subr.mxu0 %v68_v9  ;;  %192 = vmatprep.subr.mxu1 %v68_v9  ;;  %v47_v30 = vld [vmem:[#allocation5 + $0x10] sm:$0xff]  ;;  %v46_v31 = vld [vmem:[#allocation5 + $0x8] sm:$0xff]  ;;  %v45_v32 = vld [vmem:[#allocation5] sm:$0xff] }
  0x28   :  { %98 = vmatpush1.msra.mxu0 %v67_v10  ;;  %208 = vmatpush1.msra.mxu1 %v67_v10  ;;  %v43_v33 = vld [vmem:[#allocation2] sm:$0xff]  ;;  %v44_v34 = vld [vmem:[#allocation2 + $0x8] sm:$0xff] }
  0x29   :  { %99 = vmatprep.subr.mxu0 %v66_v11  ;;  %193 = vmatprep.subr.mxu1 %v66_v11  ;;  %v77_v38 = vld [vmem:[%s342_s2] sm:$0x3] }
  0x2a   :  { %100 = vmatpush1.msra.mxu0 %v65_v12  ;;  %209 = vmatpush1.msra.mxu1 %v65_v12  ;;  %v82_v40 = vrot.slane %v77_v38, %v81_v37  ;;  %v86_v41 = vrot.slane %v77_v38, %v85_v39 }
  0x2b   :  { %101 = vmatprep.subr.mxu0 %v64_v13  ;;  %194 = vmatprep.subr.mxu1 %v64_v13 }
  0x2c   :  { %102 = vmatpush1.msra.mxu0 %v63_v14  ;;  %210 = vmatpush1.msra.mxu1 %v63_v14 }
  0x2d   :  { %103 = vmatprep.subr.mxu0 %v62_v15  ;;  %195 = vmatprep.subr.mxu1 %v62_v15 }
  0x2e   :  { %104 = vmatpush1.msra.mxu0 %v61_v16  ;;  %211 = vmatpush1.msra.mxu1 %v61_v16 }
  0x2f   :  { %105 = vmatprep.subr.mxu0 %v60_v17  ;;  %196 = vmatprep.subr.mxu1 %v60_v17 }
  0x30   :  { %106 = vmatpush1.msra.mxu0 %v59_v18  ;;  %212 = vmatpush1.msra.mxu1 %v59_v18 }
  0x31   :  { %107 = vmatprep.subr.mxu0 %v58_v19  ;;  %197 = vmatprep.subr.mxu1 %v58_v19 }
  0x32   :  { %108 = vmatpush1.msra.mxu0 %v57_v20  ;;  %213 = vmatpush1.msra.mxu1 %v57_v20 }
  0x33   :  { %109 = vmatprep.subr.mxu0 %v56_v21  ;;  %198 = vmatprep.subr.mxu1 %v56_v21 }
  0x34   :  { %110 = vmatpush1.msra.mxu0 %v55_v22  ;;  %214 = vmatpush1.msra.mxu1 %v55_v22 }
  0x35   :  { %111 = vmatprep.subr.mxu0 %v54_v23  ;;  %199 = vmatprep.subr.mxu1 %v54_v23 }
  0x36   :  { %112 = vmatpush1.msra.mxu0 %v53_v24  ;;  %215 = vmatpush1.msra.mxu1 %v53_v24 }
  0x37   :  { %113 = vmatprep.subr.mxu0 %v52_v25  ;;  %200 = vmatprep.subr.mxu1 %v52_v25 }
  0x38   :  { %114 = vmatpush1.msra.mxu0 %v51_v26  ;;  %216 = vmatpush1.msra.mxu1 %v51_v26 }
  0x39   :  { %115 = vmatprep.subr.mxu0 %v50_v27  ;;  %201 = vmatprep.subr.mxu1 %v50_v27 }
  0x3a   :  { %116 = vmatpush1.msra.mxu0 %v49_v28  ;;  %217 = vmatpush1.msra.mxu1 %v49_v28 }
  0x3b   :  { %117 = vmatprep.subr.mxu0 %v48_v29  ;;  %202 = vmatprep.subr.mxu1 %v48_v29 }
  0x3c   :  { %118 = vmatpush1.msra.mxu0 %v47_v30  ;;  %218 = vmatpush1.msra.mxu1 %v47_v30 }
  0x3d   :  { %119 = vmatprep.subr.mxu0 %v46_v31  ;;  %203 = vmatprep.subr.mxu1 %v46_v31 }
  0x3e   :  { %120 = vmatpush1.msra.mxu0 %v45_v32  ;;  %219 = vmatpush1.msra.mxu1 %v45_v32 }
  0x3f   :  { %154 = vmatmul.mubr.f32.vlgmr.msra.gmra.mxu0 %v43_v33  ;;  %160 = vmatmul.mubr.f32.vlgmr.msra.gmra.mxu1 %v44_v34 }
  0xff   :  { %v155_v42 = vpop.f32.mrf.mxu0  ;;  %v161_v43 = vpop.f32.mrf.mxu1 }
 0x100   :  { %v156_v44 = vadd.f32 %v155_v42, %v82_v40  ;;  %v162_v45 = vadd.f32 %v161_v43, %v82_v40 }
 0x101   :  { %v157_v46 = vpop.f32.mrf.mxu0  ;;  %v163_v47 = vpop.f32.mrf.mxu1 }
 0x102   :  { %166 = vst [vmem:[#allocation7] sm:$0xff] %v156_v44  ;;  %168 = vst [vmem:[#allocation7 + $0x10] sm:$0xff] %v162_v45  ;;  %v158_v48 = vadd.f32 %v157_v46, %v86_v41  ;;  %v164_v49 = vadd.f32 %v163_v47, %v86_v41 }
 0x104   :  { %167 = vst [vmem:[#allocation7 + $0x8] sm:$0xff] %v158_v48  ;;  %169 = vst [vmem:[#allocation7 + $0x18] sm:$0xff] %v164_v49 }
 0x105   :  { %279 = shalt.err (!%p276_p0)
}
 0x106   :  { %181 = dma.vmem_to_hbm [thread:$0]  %s176_s27, 512, %s343_s3, [#allocation4], %s298_s22, %s298_s22, %s299_s23  }
 0x107   :  { %292 = dma.done.wait [#allocation4], 512  }
 0x108   :  { %293 = vsyncadd [#allocation4], 4294966784 }
 0x109   :  { %185 = vsyncpa [#allocation3], 1 }
 0x10a   :  { %186 = vsyncpa [#allocation6], 1 }
 0x10b   :  { %187 = vsyncpa [#allocation4], 1 }

// kernel: tpu_custom_call.1
= control target key start
LH: loop header
LB: loop body
LE: loop exit
PB: predicated region body
PF: predicated region fallthrough
CT: control target
= control target key end

     0   :  { %8 = vsyncpa [#allocation3], 0  ;;  %s340_s0 = inlined_call_operand.hbm [shape: f32[16,128], index: 0, kind: input, shape index: {}]   ;;  %s341_s1 = inlined_call_operand.hbm [shape: f32[128,256], index: 1, kind: input, shape index: {}]   ;;  %s342_s2 = inlined_call_operand.vmem [shape: f32[1,256], index: 2, kind: input, shape index: {}]   ;;  %s343_s3 = inlined_call_operand.hbm [shape: f32[16,256], index: 3, kind: output, shape index: {}]  }
   0x1   :  { %9 = vsyncpa [#allocation6], 0 }
   0x2   :  { %10 = vsyncpa [#allocation4], 0  ;;  %s294_s12 = smov [#allocation2]  }
   0x3   :  { %s16_s13 = sshll.u32 %s294_s12, 4  ;;  %s17_s13 = int_to_ptr.vmem [resolvable:$true] %s16_s13 }
   0x4   :  { %s236_s14 = scalar_lea.vmem %s17_s13, 256  ;;  %p241_p1 = scmp.lt.s32.totalorder %s17_s13, %s17_s13 }
   0x5   :  { %p237_p0 = scmp.ne.s32.totalorder %s17_s13, %s236_s14  ;;  %p242_p2 = scmp.lt.s32.totalorder %s236_s14, %s236_s14 }
   0x7   :  { %p243_p3 = por %p242_p2, %p241_p1 }
   0x9   :  { %p244_p4 = pnand %p243_p3, %p237_p0 }
   0xb   :  { %247 = shalt.err (!%p244_p4)
}
   0xc   :  { %s295_s15 = smov 128   ;;  %s296_s16 = smov 8  }
   0xd   :  { %22 = dma.hbm_to_vmem [thread:$0]  %s340_s0, 256, %s17_s13, [#allocation3], %s295_s15, %s295_s15, %s296_s16  }
   0xe   :  { %s297_s19 = smov [#allocation5]  }
   0xf   :  { %s28_s20 = sshll.u32 %s297_s19, 4  ;;  %s29_s20 = int_to_ptr.vmem [resolvable:$true] %s28_s20 }
  0x10   :  { %s256_s21 = scalar_lea.vmem %s29_s20, 4096  ;;  %p261_p6 = scmp.lt.s32.totalorder %s29_s20, %s29_s20 }
  0x11   :  { %p257_p5 = scmp.ne.s32.totalorder %s29_s20, %s256_s21  ;;  %p262_p7 = scmp.lt.s32.totalorder %s256_s21, %s256_s21 }
  0x13   :  { %p263_p8 = por %p262_p7, %p261_p6 }
  0x15   :  { %p264_p9 = pnand %p263_p8, %p257_p5 }
  0x17   :  { %267 = shalt.err (!%p264_p9)
}
  0x18   :  { %s298_s22 = smov 256   ;;  %s299_s23 = smov 16  }
  0x19   :  { %34 = dma.hbm_to_vmem [thread:$0]  %s341_s1, 4096, %s29_s20, [#allocation6], %s298_s22, %s298_s22, %s299_s23  }
  0x1a   :  { %288 = dma.done.wait [#allocation3], 256  }
  0x1b   :  { %289 = vsyncadd [#allocation3], 4294967040 }
  0x1c   :  { %290 = dma.done.wait [#allocation6], 4096  }
  0x1d   :  { %291 = vsyncadd [#allocation6], 4294963200  ;;  %v300_v0 = vmov 0.0   ;;  %v76_v1 = vld [vmem:[#allocation5 + $0xf8] sm:$0xff]  ;;  %v75_v2 = vld [vmem:[#allocation5 + $0xf0] sm:$0xff]  ;;  %v79_v35 = vlaneseq  ;;  %s301_s26 = smov [#allocation7]  }
  0x1e   :  { %153 = vmatprep.mubr.f32.mxu0 %v300_v0  ;;  %159 = vmatprep.mubr.f32.mxu1 %v300_v0  ;;  %v74_v3 = vld [vmem:[#allocation5 + $0xe8] sm:$0xff]  ;;  %v73_v4 = vld [vmem:[#allocation5 + $0xe0] sm:$0xff]  ;;  %v72_v5 = vld [vmem:[#allocation5 + $0xd8] sm:$0xff]  ;;  %s175_s27 = sshll.u32 %s301_s26, 4  ;;  %s176_s27 = int_to_ptr.vmem [resolvable:$true] %s175_s27 }
  0x1f   :  { %89 = vmatprep.subr.mxu0 %v76_v1  ;;  %188 = vmatprep.subr.mxu1 %v76_v1  ;;  %v71_v6 = vld [vmem:[#allocation5 + $0xd0] sm:$0xff]  ;;  %v70_v7 = vld [vmem:[#allocation5 + $0xc8] sm:$0xff]  ;;  %v69_v8 = vld [vmem:[#allocation5 + $0xc0] sm:$0xff]  ;;  %v80_v36 = vshrl.u32 %v79_v35, 7  ;;  %s268_s28 = scalar_lea.vmem %s176_s27, 512  ;;  %p273_p11 = scmp.lt.s32.totalorder %s176_s27, %s176_s27 }
  0x20   :  { %90 = vmatpush1.msra.mxu0 %v75_v2  ;;  %204 = vmatpush1.msra.mxu1 %v75_v2  ;;  %v68_v9 = vld [vmem:[#allocation5 + $0xb8] sm:$0xff]  ;;  %v67_v10 = vld [vmem:[#allocation5 + $0xb0] sm:$0xff]  ;;  %v66_v11 = vld [vmem:[#allocation5 + $0xa8] sm:$0xff]  ;;  %p269_p10 = scmp.ne.s32.totalorder %s176_s27, %s268_s28  ;;  %p274_p12 = scmp.lt.s32.totalorder %s268_s28, %s268_s28 }
  0x21   :  { %91 = vmatprep.subr.mxu0 %v74_v3  ;;  %189 = vmatprep.subr.mxu1 %v74_v3  ;;  %v65_v12 = vld [vmem:[#allocation5 + $0xa0] sm:$0xff]  ;;  %v64_v13 = vld [vmem:[#allocation5 + $0x98] sm:$0xff]  ;;  %v63_v14 = vld [vmem:[#allocation5 + $0x90] sm:$0xff]  ;;  %v81_v37 = vsub.s32 0, %v80_v36  ;;  %v85_v39 = vsub.s32 1, %v80_v36 }
  0x22   :  { %92 = vmatpush1.msra.mxu0 %v73_v4  ;;  %205 = vmatpush1.msra.mxu1 %v73_v4  ;;  %v62_v15 = vld [vmem:[#allocation5 + $0x88] sm:$0xff]  ;;  %v61_v16 = vld [vmem:[#allocation5 + $0x80] sm:$0xff]  ;;  %v60_v17 = vld [vmem:[#allocation5 + $0x78] sm:$0xff]  ;;  %p275_p13 = por %p274_p12, %p273_p11 }
  0x23   :  { %93 = vmatprep.subr.mxu0 %v72_v5  ;;  %190 = vmatprep.subr.mxu1 %v72_v5  ;;  %v59_v18 = vld [vmem:[#allocation5 + $0x70] sm:$0xff]  ;;  %v58_v19 = vld [vmem:[#allocation5 + $0x68] sm:$0xff]  ;;  %v57_v20 = vld [vmem:[#allocation5 + $0x60] sm:$0xff] }
  0x24   :  { %94 = vmatpush1.msra.mxu0 %v71_v6  ;;  %206 = vmatpush1.msra.mxu1 %v71_v6  ;;  %v56_v21 = vld [vmem:[#allocation5 + $0x58] sm:$0xff]  ;;  %v55_v22 = vld [vmem:[#allocation5 + $0x50] sm:$0xff]  ;;  %v54_v23 = vld [vmem:[#allocation5 + $0x48] sm:$0xff]  ;;  %p276_p0 = pnand %p275_p13, %p269_p10 }
  0x25   :  { %95 = vmatprep.subr.mxu0 %v70_v7  ;;  %191 = vmatprep.subr.mxu1 %v70_v7  ;;  %v53_v24 = vld [vmem:[#allocation5 + $0x40] sm:$0xff]  ;;  %v52_v25 = vld [vmem:[#allocation5 + $0x38] sm:$0xff]  ;;  %v51_v26 = vld [vmem:[#allocation5 + $0x30] sm:$0xff] }
  0x26   :  { %96 = vmatpush1.msra.mxu0 %v69_v8  ;;  %207 = vmatpush1.msra.mxu1 %v69_v8  ;;  %v50_v27 = vld [vmem:[#allocation5 + $0x28] sm:$0xff]  ;;  %v49_v28 = vld [vmem:[#allocation5 + $0x20] sm:$0xff]  ;;  %v48_v29 = vld [vmem:[#allocation5 + $0x18] sm:$0xff] }
  0x27   :  { %97 = vmatprep.subr.mxu0 %v68_v9  ;;  %192 = vmatprep.subr.mxu1 %v68_v9  ;;  %v47_v30 = vld [vmem:[#allocation5 + $0x10] sm:$0xff]  ;;  %v46_v31 = vld [vmem:[#allocation5 + $0x8] sm:$0xff]  ;;  %v45_v32 = vld [vmem:[#allocation5] sm:$0xff] }
  0x28   :  { %98 = vmatpush1.msra.mxu0 %v67_v10  ;;  %208 = vmatpush1.msra.mxu1 %v67_v10  ;;  %v43_v33 = vld [vmem:[#allocation2] sm:$0xff]  ;;  %v44_v34 = vld [vmem:[#allocation2 + $0x8] sm:$0xff] }
  0x29   :  { %99 = vmatprep.subr.mxu0 %v66_v11  ;;  %193 = vmatprep.subr.mxu1 %v66_v11  ;;  %v77_v38 = vld [vmem:[%s342_s2] sm:$0x3] }
  0x2a   :  { %100 = vmatpush1.msra.mxu0 %v65_v12  ;;  %209 = vmatpush1.msra.mxu1 %v65_v12  ;;  %v82_v40 = vrot.slane %v77_v38, %v81_v37  ;;  %v86_v41 = vrot.slane %v77_v38, %v85_v39 }
  0x2b   :  { %101 = vmatprep.subr.mxu0 %v64_v13  ;;  %194 = vmatprep.subr.mxu1 %v64_v13 }
  0x2c   :  { %102 = vmatpush1.msra.mxu0 %v63_v14  ;;  %210 = vmatpush1.msra.mxu1 %v63_v14 }
  0x2d   :  { %103 = vmatprep.subr.mxu0 %v62_v15  ;;  %195 = vmatprep.subr.mxu1 %v62_v15 }
  0x2e   :  { %104 = vmatpush1.msra.mxu0 %v61_v16  ;;  %211 = vmatpush1.msra.mxu1 %v61_v16 }
  0x2f   :  { %105 = vmatprep.subr.mxu0 %v60_v17  ;;  %196 = vmatprep.subr.mxu1 %v60_v17 }
  0x30   :  { %106 = vmatpush1.msra.mxu0 %v59_v18  ;;  %212 = vmatpush1.msra.mxu1 %v59_v18 }
  0x31   :  { %107 = vmatprep.subr.mxu0 %v58_v19  ;;  %197 = vmatprep.subr.mxu1 %v58_v19 }
  0x32   :  { %108 = vmatpush1.msra.mxu0 %v57_v20  ;;  %213 = vmatpush1.msra.mxu1 %v57_v20 }
  0x33   :  { %109 = vmatprep.subr.mxu0 %v56_v21  ;;  %198 = vmatprep.subr.mxu1 %v56_v21 }
  0x34   :  { %110 = vmatpush1.msra.mxu0 %v55_v22  ;;  %214 = vmatpush1.msra.mxu1 %v55_v22 }
  0x35   :  { %111 = vmatprep.subr.mxu0 %v54_v23  ;;  %199 = vmatprep.subr.mxu1 %v54_v23 }
  0x36   :  { %112 = vmatpush1.msra.mxu0 %v53_v24  ;;  %215 = vmatpush1.msra.mxu1 %v53_v24 }
  0x37   :  { %113 = vmatprep.subr.mxu0 %v52_v25  ;;  %200 = vmatprep.subr.mxu1 %v52_v25 }
  0x38   :  { %114 = vmatpush1.msra.mxu0 %v51_v26  ;;  %216 = vmatpush1.msra.mxu1 %v51_v26 }
  0x39   :  { %115 = vmatprep.subr.mxu0 %v50_v27  ;;  %201 = vmatprep.subr.mxu1 %v50_v27 }
  0x3a   :  { %116 = vmatpush1.msra.mxu0 %v49_v28  ;;  %217 = vmatpush1.msra.mxu1 %v49_v28 }
  0x3b   :  { %117 = vmatprep.subr.mxu0 %v48_v29  ;;  %202 = vmatprep.subr.mxu1 %v48_v29 }
  0x3c   :  { %118 = vmatpush1.msra.mxu0 %v47_v30  ;;  %218 = vmatpush1.msra.mxu1 %v47_v30 }
  0x3d   :  { %119 = vmatprep.subr.mxu0 %v46_v31  ;;  %203 = vmatprep.subr.mxu1 %v46_v31 }
  0x3e   :  { %120 = vmatpush1.msra.mxu0 %v45_v32  ;;  %219 = vmatpush1.msra.mxu1 %v45_v32 }
  0x3f   :  { %154 = vmatmul.mubr.f32.vlgmr.msra.gmra.mxu0 %v43_v33  ;;  %160 = vmatmul.mubr.f32.vlgmr.msra.gmra.mxu1 %v44_v34 }
  0xff   :  { %v155_v42 = vpop.f32.mrf.mxu0  ;;  %v161_v43 = vpop.f32.mrf.mxu1 }
 0x100   :  { %v156_v44 = vadd.f32 %v155_v42, %v82_v40  ;;  %v162_v45 = vadd.f32 %v161_v43, %v82_v40 }
 0x101   :  { %v157_v46 = vpop.f32.mrf.mxu0  ;;  %v163_v47 = vpop.f32.mrf.mxu1 }
 0x102   :  { %166 = vst [vmem:[#allocation7] sm:$0xff] %v156_v44  ;;  %168 = vst [vmem:[#allocation7 + $0x10] sm:$0xff] %v162_v45  ;;  %v158_v48 = vadd.f32 %v157_v46, %v86_v41  ;;  %v164_v49 = vadd.f32 %v163_v47, %v86_v41 }
 0x104   :  { %167 = vst [vmem:[#allocation7 + $0x8] sm:$0xff] %v158_v48  ;;  %169 = vst [vmem:[#allocation7 + $0x18] sm:$0xff] %v164_v49 }
 0x105   :  { %279 = shalt.err (!%p276_p0)
}
 0x106   :  { %181 = dma.vmem_to_hbm [thread:$0]  %s176_s27, 512, %s343_s3, [#allocation4], %s298_s22, %s298_s22, %s299_s23  }
 0x107   :  { %292 = dma.done.wait [#allocation4], 512  }
 0x108   :  { %293 = vsyncadd [#allocation4], 4294966784 }
 0x109   :  { %185 = vsyncpa [#allocation3], 1 }
 0x10a   :  { %186 = vsyncpa [#allocation6], 1 }
 0x10b   :  { %187 = vsyncpa [#allocation4], 1 }

</bundles_post_ra>
